<compile_context>
chip_gen: v7x
topology: tpu7x:2x2x1
jax: 0.10.0
libtpu: 0.0.40
codegen_flags: <defaults>
</compile_context>

<pallas_src>
import functools
import numpy as np
import jax
import jax.numpy as jnp
from jax import lax
from jax.experimental import pallas as pl
from jax.experimental.pallas import tpu as pltpu

# ---- module hyper-parameters (deterministic, synthetic) ----
PATCH = 7
IMG_PIX = PATCH * PATCH          # 49
SKIP = 6                         # LinearInputSkipSize
FEAT_IN = IMG_PIX + SKIP + 2     # 57 columns of inputSample
OUT_CH = [8, 16, 32, 16, 8]      # outChannelsSizes
KSIZES = [3, 3]
POOL = 2
ALPHA_LEAKY = 0.01

# AutoComputeConvBlocksOutput equivalent: 7 -(conv3)-> 5 -(pool2,s1)-> 4 -(conv3)-> 2 -(pool2,s1)-> 1
H1 = PATCH - KSIZES[0] + 1       # 5
P1 = H1 - POOL + 1               # 4
H2 = P1 - KSIZES[1] + 1          # 2
CONV_FEATS = OUT_CH[1]           # LinearInputFeaturesSize = 16
LIN_IN = CONV_FEATS + SKIP       # LinearInputSize = 22

N_P1 = P1 * P1 * OUT_CH[0]       # 128: pooled-conv1 features per row (lane-dense)
N_C2 = H2 * H2 * OUT_CH[1]       # 64 : conv2 features per row (4 positions x 16 ch)


def _leaky(x):
    return jnp.where(x > 0, x, ALPHA_LEAKY * x)


def _forward_kernel(x_ref, m1_ref, b1_ref, w2_ref, b2_ref,
                    w4f_ref, w4c_ref, w5_ref, b5_ref, w6_ref, b6_ref,
                    wpf_ref, wpc_ref, bp_ref, wo_ref, bo_ref,
                    out_ref):
    # static lane slices of the single packed input block
    patch = x_ref[:, 0:IMG_PIX]                      # (TB, 49)
    ctx = x_ref[:, IMG_PIX:IMG_PIX + SKIP]           # (TB, 6)
    cen = x_ref[:, IMG_PIX + SKIP:FEAT_IN]           # (TB, 2)

    # ---- conv2dL1 + leakyReLU + maxPoolL1 : one matmul + 4-way lane max ----
    c1 = jnp.dot(patch, m1_ref[...], preferred_element_type=jnp.float32)   # (TB, 512)
    m = jnp.maximum(jnp.maximum(c1[:, 0:N_P1], c1[:, N_P1:2 * N_P1]),
                    jnp.maximum(c1[:, 2 * N_P1:3 * N_P1], c1[:, 3 * N_P1:4 * N_P1]))
    p1 = _leaky(m + b1_ref[...])                                            # (TB, 128)

    # ---- conv2dL2 + leakyReLU + maxPoolL2 + Flatten : one im2col matmul + 4-way lane max ----
    c2 = _leaky(jnp.dot(p1, w2_ref[...], preferred_element_type=jnp.float32)
                + b2_ref[...])                                              # (TB, 64)
    C1c = OUT_CH[1]
    feat = jnp.maximum(jnp.maximum(c2[:, 0:C1c], c2[:, C1c:2 * C1c]),
                       jnp.maximum(c2[:, 2 * C1c:3 * C1c], c2[:, 3 * C1c:4 * C1c]))  # (TB, 16)

    # ---- DenseL4 (bias=False, dropout=identity) + tanh: concat folded into two dots ----
    h = jnp.tanh(jnp.dot(feat, w4f_ref[...], preferred_element_type=jnp.float32)
                 + jnp.dot(ctx, w4c_ref[...], preferred_element_type=jnp.float32))
    # ---- DenseL5 + tanh ----
    h = jnp.tanh(jnp.dot(h, w5_ref[...], preferred_element_type=jnp.float32) + b5_ref[...])
    # ---- DenseL6 + leaky ReLU ----
    h = _leaky(jnp.dot(h, w6_ref[...], preferred_element_type=jnp.float32) + b6_ref[...])
    # ---- DensePreOutput on concat(h, pixPatchCentre), then residual add of pixPatchCentre ----
    p = (jnp.dot(h, wpf_ref[...], preferred_element_type=jnp.float32)
         + jnp.dot(cen, wpc_ref[...], preferred_element_type=jnp.float32)
         + bp_ref[...])
    p = p + cen
    # ---- DenseOutput ----
    out_ref[...] = (jnp.dot(p, wo_ref[...], preferred_element_type=jnp.float32)
                    + bo_ref[...])


# ---- wrapper-side constant folding of the conv stages into matmul weights ----
def pack_params(params):
    C0, C1, C2, C3, C4 = OUT_CH
    W1 = np.asarray(params["W1"], np.float32)        # (C0, 1, 3, 3)
    b1 = np.asarray(params["b1"], np.float32)
    W2 = np.asarray(params["W2"], np.float32)        # (C1, C0, 3, 3)
    b2 = np.asarray(params["b2"], np.float32)

    # conv1+pool1: M1[patch_col, shift*128 + (i*4+j)*C0 + c]
    # patch col p = 7*w + h  (torch .T.reshape(7,-1,1,B).T trick => img[b,0,h,w] = patch[b, 7*w+h])
    m1 = np.zeros((IMG_PIX, 4 * N_P1), np.float32)
    for s, (si, sj) in enumerate(((0, 0), (0, 1), (1, 0), (1, 1))):
        for i in range(P1):
            for j in range(P1):
                col = s * N_P1 + (i * P1 + j) * C0
                for di in range(KSIZES[0]):
                    for dj in range(KSIZES[0]):
                        row = PATCH * (j + sj + dj) + (i + si + di)
                        m1[row, col:col + C0] += W1[:, 0, di, dj]
    b1t = np.tile(b1, P1 * P1)[None, :]               # (1, 128)

    # conv2 im2col: W2big[(pi*4+pj)*C0 + c0, (m*2+n)*C1 + c1]
    w2big = np.zeros((N_P1, N_C2), np.float32)
    for m in range(H2):
        for n in range(H2):
            col = (m * H2 + n) * C1
            for di in range(KSIZES[1]):
                for dj in range(KSIZES[1]):
                    row = ((m + di) * P1 + (n + dj)) * C0
                    w2big[row:row + C0, col:col + C1] += W2[:, :, di, dj].T
    b2t = np.tile(b2, H2 * H2)[None, :]               # (1, 64)

    w4 = np.asarray(params["W4"], np.float32).T       # (22, 32)
    wp = np.asarray(params["Wp"], np.float32).T       # (10, 2)
    packed = (m1, b1t, w2big, b2t,
              w4[:CONV_FEATS], w4[CONV_FEATS:],
              np.asarray(params["W5"], np.float32).T, np.asarray(params["b5"], np.float32)[None, :],
              np.asarray(params["W6"], np.float32).T, np.asarray(params["b6"], np.float32)[None, :],
              wp[:C4], wp[C4:], np.asarray(params["bp"], np.float32)[None, :],
              np.asarray(params["Wo"], np.float32).T, np.asarray(params["bo"], np.float32)[None, :])
    return tuple(jnp.asarray(a) for a in packed)


@functools.partial(jax.jit, static_argnums=(2,))
def _forward_jit(x, packed, tb):
    B = x.shape[0]
    nb = -(-B // tb)
    Bp = nb * tb
    if Bp != B:
        x = jnp.pad(x, ((0, Bp - B), (0, 0)))

    def const_spec(a):
        return pl.BlockSpec(a.shape, lambda i: (0,) * a.ndim)

    in_specs = [pl.BlockSpec((tb, FEAT_IN), lambda i: (i, 0))] + [const_spec(a) for a in packed]

    out = pl.pallas_call(
        _forward_kernel,
        out_shape=jax.ShapeDtypeStruct((Bp, 2), jnp.float32),
        grid=(nb,),
        in_specs=in_specs,
        out_specs=pl.BlockSpec((tb, 2), lambda i: (i, 0)),
        compiler_params=pltpu.CompilerParams(dimension_semantics=("parallel",)),
    )(x, *packed)
    return out[:B]


def horizon_enhancer_forward(x, packed, batch_tile=None):
    B = x.shape[0]
    if batch_tile is None:
        batch_tile = 512 if B >= 512 else -(-B // 8) * 8   # per-tile VMEM ~0.6 MiB -> fits v7x easily
    batch_tile = max(8, (int(batch_tile) // 8) * 8)
    return _forward_jit(x, packed, batch_tile)


# ---- deterministic parameter init (shapes from the module __init__) ----
def init_params(key):
    C0, C1, C2, C3, C4 = OUT_CH
    keys = jax.random.split(key, 13)

    def u(k, shape, fan_in):
        bound = 1.0 / np.sqrt(fan_in)
        return jax.random.uniform(k, shape, jnp.float32, -bound, bound)

    return {
        "W1": u(keys[0], (C0, 1, 3, 3), 9),
        "b1": u(keys[1], (C0,), 9),
        "W2": u(keys[2], (C1, C0, 3, 3), C0 * 9),
        "b2": u(keys[3], (C1,), C0 * 9),
        "W4": u(keys[4], (C2, LIN_IN), LIN_IN),          # bias=False
        "W5": u(keys[5], (C3, C2), C2),
        "b5": u(keys[6], (C3,), C2),
        "W6": u(keys[7], (C4, C3), C3),
        "b6": u(keys[8], (C4,), C3),
        "Wp": u(keys[9], (2, C4 + 2), C4 + 2),
        "bp": u(keys[10], (2,), C4 + 2),
        "Wo": u(keys[11], (2, 2), 2),
        "bo": u(keys[12], (2,), 2),
    }


# ---- pure-JAX reference (NCHW, mirrors the torch forward semantics) ----
def reference_forward(input_sample, params):
    B = input_sample.shape[0]
    patch = input_sample[:, :IMG_PIX]
    ctx = input_sample[:, IMG_PIX:IMG_PIX + SKIP]
    cen = input_sample[:, IMG_PIX + SKIP:IMG_PIX + SKIP + 2]
    img = jnp.transpose(patch.reshape(B, PATCH, PATCH), (0, 2, 1))[:, None]

    dn = ('NCHW', 'OIHW', 'NCHW')
    x = lax.conv_general_dilated(img, params["W1"], (1, 1), 'VALID',
                                 dimension_numbers=dn) + params["b1"][None, :, None, None]
    x = _leaky(x)
    x = lax.reduce_window(x, -jnp.inf, lax.max, (1, 1, POOL, POOL), (1, 1, 1, 1), 'VALID')
    x = lax.conv_general_dilated(x, params["W2"], (1, 1), 'VALID',
                                 dimension_numbers=dn) + params["b2"][None, :, None, None]
    x = _leaky(x)
    x = lax.reduce_window(x, -jnp.inf, lax.max, (1, 1, POOL, POOL), (1, 1, 1, 1), 'VALID')
    feat = x.reshape(B, -1)
    val = jnp.concatenate([feat, ctx], axis=1)
    val = jnp.tanh(val @ params["W4"].T)
    val = jnp.tanh(val @ params["W5"].T + params["b5"])
    val = _leaky(val @ params["W6"].T + params["b6"])
    val = jnp.concatenate([val, cen], axis=1) @ params["Wp"].T + params["bp"]
    val = val + cen
    return val @ params["Wo"].T + params["bo"]


if __name__ == "__main__":
    key = jax.random.PRNGKey(0)
    kp, kx = jax.random.split(key)
    params = init_params(kp)
    packed = pack_params(params)

    # (B, batch_tile): second case exercises a multi-step grid (3 tiles) + batch padding path.
    for B, tb in ((12, None), (48, 16)):
        x = jax.random.uniform(jax.random.fold_in(kx, B), (B, FEAT_IN), jnp.float32, -1.0, 1.0)
        out = jax.block_until_ready(horizon_enhancer_forward(x, packed, tb))
        ref = reference_forward(x, params)
        np.testing.assert_allclose(np.asarray(out), np.asarray(ref), rtol=1e-3, atol=1e-3)

    print("KERNEL_OK")
</pallas_src>

<mosaic_0001>
module attributes {stable_mosaic.version = 11 : i64} {
  func.func @_forward_kernel(%arg0: i32, %arg1: memref<16x57xf32, #tpu.memory_space<vmem>>, %arg2: memref<49x512xf32, #tpu.memory_space<vmem>>, %arg3: memref<1x128xf32, #tpu.memory_space<vmem>>, %arg4: memref<128x64xf32, #tpu.memory_space<vmem>>, %arg5: memref<1x64xf32, #tpu.memory_space<vmem>>, %arg6: memref<16x32xf32, #tpu.memory_space<vmem>>, %arg7: memref<6x32xf32, #tpu.memory_space<vmem>>, %arg8: memref<32x16xf32, #tpu.memory_space<vmem>>, %arg9: memref<1x16xf32, #tpu.memory_space<vmem>>, %arg10: memref<16x8xf32, #tpu.memory_space<vmem>>, %arg11: memref<1x8xf32, #tpu.memory_space<vmem>>, %arg12: memref<8x2xf32, #tpu.memory_space<vmem>>, %arg13: memref<2x2xf32, #tpu.memory_space<vmem>>, %arg14: memref<1x2xf32, #tpu.memory_space<vmem>>, %arg15: memref<2x2xf32, #tpu.memory_space<vmem>>, %arg16: memref<1x2xf32, #tpu.memory_space<vmem>>, %arg17: memref<16x2xf32, #tpu.memory_space<vmem>>) attributes {dimension_semantics = [#tpu.dimension_semantics<parallel>], iteration_bounds = array<i64: 1>, scalar_prefetch = 0 : i64, scratch_operands = 0 : i64, tpu.core_type = #tpu.core_type<tc>, window_params = [{transform_indices = @transform_0, window_bounds = array<i64: 16, 57>}, {pipeline_mode = #tpu.pipeline_mode<synchronous>, transform_indices = @transform_1, window_bounds = array<i64: 49, 512>}, {pipeline_mode = #tpu.pipeline_mode<synchronous>, transform_indices = @transform_2, window_bounds = array<i64: 1, 128>}, {pipeline_mode = #tpu.pipeline_mode<synchronous>, transform_indices = @transform_3, window_bounds = array<i64: 128, 64>}, {pipeline_mode = #tpu.pipeline_mode<synchronous>, transform_indices = @transform_4, window_bounds = array<i64: 1, 64>}, {pipeline_mode = #tpu.pipeline_mode<synchronous>, transform_indices = @transform_5, window_bounds = array<i64: 16, 32>}, {pipeline_mode = #tpu.pipeline_mode<synchronous>, transform_indices = @transform_6, window_bounds = array<i64: 6, 32>}, {pipeline_mode = #tpu.pipeline_mode<synchronous>, transform_indices = @transform_7, window_bounds = array<i64: 32, 16>}, {pipeline_mode = #tpu.pipeline_mode<synchronous>, transform_indices = @transform_8, window_bounds = array<i64: 1, 16>}, {pipeline_mode = #tpu.pipeline_mode<synchronous>, transform_indices = @transform_9, window_bounds = array<i64: 16, 8>}, {pipeline_mode = #tpu.pipeline_mode<synchronous>, transform_indices = @transform_10, window_bounds = array<i64: 1, 8>}, {pipeline_mode = #tpu.pipeline_mode<synchronous>, transform_indices = @transform_11, window_bounds = array<i64: 8, 2>}, {pipeline_mode = #tpu.pipeline_mode<synchronous>, transform_indices = @transform_12, window_bounds = array<i64: 2, 2>}, {pipeline_mode = #tpu.pipeline_mode<synchronous>, transform_indices = @transform_13, window_bounds = array<i64: 1, 2>}, {pipeline_mode = #tpu.pipeline_mode<synchronous>, transform_indices = @transform_14, window_bounds = array<i64: 2, 2>}, {pipeline_mode = #tpu.pipeline_mode<synchronous>, transform_indices = @transform_15, window_bounds = array<i64: 1, 2>}, {transform_indices = @transform_16, window_bounds = array<i64: 16, 2>}]} {
    %c0 = arith.constant 0 : index
    %c0_0 = arith.constant 0 : index
    %0 = vector.load %arg1[%c0, %c0_0] : memref<16x57xf32, #tpu.memory_space<vmem>>, vector<16x49xf32>
    %c0_1 = arith.constant 0 : index
    %c49 = arith.constant 49 : index
    %1 = vector.load %arg1[%c0_1, %c49] : memref<16x57xf32, #tpu.memory_space<vmem>>, vector<16x6xf32>
    %c0_2 = arith.constant 0 : index
    %c55 = arith.constant 55 : index
    %2 = vector.load %arg1[%c0_2, %c55] : memref<16x57xf32, #tpu.memory_space<vmem>>, vector<16x2xf32>
    %c0_3 = arith.constant 0 : index
    %c0_4 = arith.constant 0 : index
    %3 = vector.load %arg2[%c0_3, %c0_4] : memref<49x512xf32, #tpu.memory_space<vmem>>, vector<49x512xf32>
    %cst = arith.constant dense<0.000000e+00> : vector<16x512xf32>
    %4 = tpu.matmul %0, %3, %cst {dimension_numbers = #tpu.dot_dimension_numbers<[1], [0], [0], [1], [0, 0, 1, 1], [], []>} : vector<16x49xf32>, vector<49x512xf32>, vector<16x512xf32> -> vector<16x512xf32>
    %5 = vector.extract_strided_slice %4 {offsets = [0, 0], sizes = [16, 128], strides = [1, 1]} : vector<16x512xf32> to vector<16x128xf32>
    %6 = vector.extract_strided_slice %4 {offsets = [0, 128], sizes = [16, 128], strides = [1, 1]} : vector<16x512xf32> to vector<16x128xf32>
    %7 = arith.maximumf %5, %6 : vector<16x128xf32>
    %8 = vector.extract_strided_slice %4 {offsets = [0, 256], sizes = [16, 128], strides = [1, 1]} : vector<16x512xf32> to vector<16x128xf32>
    %9 = vector.extract_strided_slice %4 {offsets = [0, 384], sizes = [16, 128], strides = [1, 1]} : vector<16x512xf32> to vector<16x128xf32>
    %10 = arith.maximumf %8, %9 : vector<16x128xf32>
    %11 = arith.maximumf %7, %10 : vector<16x128xf32>
    %c0_5 = arith.constant 0 : index
    %c0_6 = arith.constant 0 : index
    %12 = vector.load %arg3[%c0_5, %c0_6] : memref<1x128xf32, #tpu.memory_space<vmem>>, vector<1x128xf32>
    %13 = vector.broadcast %12 : vector<1x128xf32> to vector<16x128xf32>
    %14 = arith.addf %11, %13 : vector<16x128xf32>
    %cst_7 = arith.constant 0.000000e+00 : f32
    %15 = vector.broadcast %cst_7 : f32 to vector<16x128xf32>
    %16 = arith.cmpf ogt, %14, %15 : vector<16x128xf32>
    %cst_8 = arith.constant 0.00999999977 : f32
    %17 = vector.broadcast %cst_8 : f32 to vector<16x128xf32>
    %18 = arith.mulf %17, %14 : vector<16x128xf32>
    %19 = arith.select %16, %14, %18 : vector<16x128xi1>, vector<16x128xf32>
    %c0_9 = arith.constant 0 : index
    %c0_10 = arith.constant 0 : index
    %20 = vector.load %arg4[%c0_9, %c0_10] : memref<128x64xf32, #tpu.memory_space<vmem>>, vector<128x64xf32>
    %cst_11 = arith.constant dense<0.000000e+00> : vector<16x64xf32>
    %21 = tpu.matmul %19, %20, %cst_11 {dimension_numbers = #tpu.dot_dimension_numbers<[1], [0], [0], [1], [0, 0, 1, 1], [], []>} : vector<16x128xf32>, vector<128x64xf32>, vector<16x64xf32> -> vector<16x64xf32>
    %c0_12 = arith.constant 0 : index
    %c0_13 = arith.constant 0 : index
    %22 = vector.load %arg5[%c0_12, %c0_13] : memref<1x64xf32, #tpu.memory_space<vmem>>, vector<1x64xf32>
    %23 = vector.broadcast %22 : vector<1x64xf32> to vector<16x64xf32>
    %24 = arith.addf %21, %23 : vector<16x64xf32>
    %cst_14 = arith.constant 0.000000e+00 : f32
    %25 = vector.broadcast %cst_14 : f32 to vector<16x64xf32>
    %26 = arith.cmpf ogt, %24, %25 : vector<16x64xf32>
    %cst_15 = arith.constant 0.00999999977 : f32
    %27 = vector.broadcast %cst_15 : f32 to vector<16x64xf32>
    %28 = arith.mulf %27, %24 : vector<16x64xf32>
    %29 = arith.select %26, %24, %28 : vector<16x64xi1>, vector<16x64xf32>
    %30 = vector.extract_strided_slice %29 {offsets = [0, 0], sizes = [16, 16], strides = [1, 1]} : vector<16x64xf32> to vector<16x16xf32>
    %31 = vector.extract_strided_slice %29 {offsets = [0, 16], sizes = [16, 16], strides = [1, 1]} : vector<16x64xf32> to vector<16x16xf32>
    %32 = arith.maximumf %30, %31 : vector<16x16xf32>
    %33 = vector.extract_strided_slice %29 {offsets = [0, 32], sizes = [16, 16], strides = [1, 1]} : vector<16x64xf32> to vector<16x16xf32>
    %34 = vector.extract_strided_slice %29 {offsets = [0, 48], sizes = [16, 16], strides = [1, 1]} : vector<16x64xf32> to vector<16x16xf32>
    %35 = arith.maximumf %33, %34 : vector<16x16xf32>
    %36 = arith.maximumf %32, %35 : vector<16x16xf32>
    %c0_16 = arith.constant 0 : index
    %c0_17 = arith.constant 0 : index
    %37 = vector.load %arg6[%c0_16, %c0_17] : memref<16x32xf32, #tpu.memory_space<vmem>>, vector<16x32xf32>
    %cst_18 = arith.constant dense<0.000000e+00> : vector<16x32xf32>
    %38 = tpu.matmul %36, %37, %cst_18 {dimension_numbers = #tpu.dot_dimension_numbers<[1], [0], [0], [1], [0, 0, 1, 1], [], []>} : vector<16x16xf32>, vector<16x32xf32>, vector<16x32xf32> -> vector<16x32xf32>
    %c0_19 = arith.constant 0 : index
    %c0_20 = arith.constant 0 : index
    %39 = vector.load %arg7[%c0_19, %c0_20] : memref<6x32xf32, #tpu.memory_space<vmem>>, vector<6x32xf32>
    %cst_21 = arith.constant dense<0.000000e+00> : vector<16x32xf32>
    %40 = tpu.matmul %1, %39, %cst_21 {dimension_numbers = #tpu.dot_dimension_numbers<[1], [0], [0], [1], [0, 0, 1, 1], [], []>} : vector<16x6xf32>, vector<6x32xf32>, vector<16x32xf32> -> vector<16x32xf32>
    %41 = arith.addf %38, %40 : vector<16x32xf32>
    %42 = math.tanh %41 : vector<16x32xf32>
    %c0_22 = arith.constant 0 : index
    %c0_23 = arith.constant 0 : index
    %43 = vector.load %arg8[%c0_22, %c0_23] : memref<32x16xf32, #tpu.memory_space<vmem>>, vector<32x16xf32>
    %cst_24 = arith.constant dense<0.000000e+00> : vector<16x16xf32>
    %44 = tpu.matmul %42, %43, %cst_24 {dimension_numbers = #tpu.dot_dimension_numbers<[1], [0], [0], [1], [0, 0, 1, 1], [], []>} : vector<16x32xf32>, vector<32x16xf32>, vector<16x16xf32> -> vector<16x16xf32>
    %c0_25 = arith.constant 0 : index
    %c0_26 = arith.constant 0 : index
    %45 = vector.load %arg9[%c0_25, %c0_26] : memref<1x16xf32, #tpu.memory_space<vmem>>, vector<1x16xf32>
    %46 = vector.broadcast %45 : vector<1x16xf32> to vector<16x16xf32>
    %47 = arith.addf %44, %46 : vector<16x16xf32>
    %48 = math.tanh %47 : vector<16x16xf32>
    %c0_27 = arith.constant 0 : index
    %c0_28 = arith.constant 0 : index
    %49 = vector.load %arg10[%c0_27, %c0_28] : memref<16x8xf32, #tpu.memory_space<vmem>>, vector<16x8xf32>
    %cst_29 = arith.constant dense<0.000000e+00> : vector<16x8xf32>
    %50 = tpu.matmul %48, %49, %cst_29 {dimension_numbers = #tpu.dot_dimension_numbers<[1], [0], [0], [1], [0, 0, 1, 1], [], []>} : vector<16x16xf32>, vector<16x8xf32>, vector<16x8xf32> -> vector<16x8xf32>
    %c0_30 = arith.constant 0 : index
    %c0_31 = arith.constant 0 : index
    %51 = vector.load %arg11[%c0_30, %c0_31] : memref<1x8xf32, #tpu.memory_space<vmem>>, vector<1x8xf32>
    %52 = vector.broadcast %51 : vector<1x8xf32> to vector<16x8xf32>
    %53 = arith.addf %50, %52 : vector<16x8xf32>
    %cst_32 = arith.constant 0.000000e+00 : f32
    %54 = vector.broadcast %cst_32 : f32 to vector<16x8xf32>
    %55 = arith.cmpf ogt, %53, %54 : vector<16x8xf32>
    %cst_33 = arith.constant 0.00999999977 : f32
    %56 = vector.broadcast %cst_33 : f32 to vector<16x8xf32>
    %57 = arith.mulf %56, %53 : vector<16x8xf32>
    %58 = arith.select %55, %53, %57 : vector<16x8xi1>, vector<16x8xf32>
    %c0_34 = arith.constant 0 : index
    %c0_35 = arith.constant 0 : index
    %59 = vector.load %arg12[%c0_34, %c0_35] : memref<8x2xf32, #tpu.memory_space<vmem>>, vector<8x2xf32>
    %cst_36 = arith.constant dense<0.000000e+00> : vector<16x2xf32>
    %60 = tpu.matmul %58, %59, %cst_36 {dimension_numbers = #tpu.dot_dimension_numbers<[1], [0], [0], [1], [0, 0, 1, 1], [], []>} : vector<16x8xf32>, vector<8x2xf32>, vector<16x2xf32> -> vector<16x2xf32>
    %c0_37 = arith.constant 0 : index
    %c0_38 = arith.constant 0 : index
    %61 = vector.load %arg13[%c0_37, %c0_38] : memref<2x2xf32, #tpu.memory_space<vmem>>, vector<2x2xf32>
    %cst_39 = arith.constant dense<0.000000e+00> : vector<16x2xf32>
    %62 = tpu.matmul %2, %61, %cst_39 {dimension_numbers = #tpu.dot_dimension_numbers<[1], [0], [0], [1], [0, 0, 1, 1], [], []>} : vector<16x2xf32>, vector<2x2xf32>, vector<16x2xf32> -> vector<16x2xf32>
    %63 = arith.addf %60, %62 : vector<16x2xf32>
    %c0_40 = arith.constant 0 : index
    %c0_41 = arith.constant 0 : index
    %64 = vector.load %arg14[%c0_40, %c0_41] : memref<1x2xf32, #tpu.memory_space<vmem>>, vector<1x2xf32>
    %65 = vector.broadcast %64 : vector<1x2xf32> to vector<16x2xf32>
    %66 = arith.addf %63, %65 : vector<16x2xf32>
    %67 = arith.addf %66, %2 : vector<16x2xf32>
    %c0_42 = arith.constant 0 : index
    %c0_43 = arith.constant 0 : index
    %68 = vector.load %arg15[%c0_42, %c0_43] : memref<2x2xf32, #tpu.memory_space<vmem>>, vector<2x2xf32>
    %cst_44 = arith.constant dense<0.000000e+00> : vector<16x2xf32>
    %69 = tpu.matmul %67, %68, %cst_44 {dimension_numbers = #tpu.dot_dimension_numbers<[1], [0], [0], [1], [0, 0, 1, 1], [], []>} : vector<16x2xf32>, vector<2x2xf32>, vector<16x2xf32> -> vector<16x2xf32>
    %c0_45 = arith.constant 0 : index
    %c0_46 = arith.constant 0 : index
    %70 = vector.load %arg16[%c0_45, %c0_46] : memref<1x2xf32, #tpu.memory_space<vmem>>, vector<1x2xf32>
    %71 = vector.broadcast %70 : vector<1x2xf32> to vector<16x2xf32>
    %72 = arith.addf %69, %71 : vector<16x2xf32>
    %c0_47 = arith.constant 0 : index
    %c0_48 = arith.constant 0 : index
    %73 = vector.load %arg17[%c0_47, %c0_48] : memref<16x2xf32, #tpu.memory_space<vmem>>, vector<16x2xf32>
    tpu.vector_store %arg17[%c0_47, %c0_48], %72 {strides = array<i32>} : memref<16x2xf32, #tpu.memory_space<vmem>>, vector<16x2xf32>,
    return
  }
  func.func @transform_0(%arg0: i32) -> (i32, i32) {
    %c0_i32 = arith.constant 0 : i32
    %c0_i32_0 = arith.constant 0 : i32
    return %arg0, %c0_i32 : i32, i32
  }
  func.func @transform_1(%arg0: i32) -> (i32, i32) {
    %c0_i32 = arith.constant 0 : i32
    %c0_i32_0 = arith.constant 0 : i32
    %c0_i32_1 = arith.constant 0 : i32
    return %c0_i32, %c0_i32_0 : i32, i32
  }
  func.func @transform_2(%arg0: i32) -> (i32, i32) {
    %c0_i32 = arith.constant 0 : i32
    %c0_i32_0 = arith.constant 0 : i32
    %c0_i32_1 = arith.constant 0 : i32
    return %c0_i32, %c0_i32_0 : i32, i32
  }
  func.func @transform_3(%arg0: i32) -> (i32, i32) {
    %c0_i32 = arith.constant 0 : i32
    %c0_i32_0 = arith.constant 0 : i32
    %c0_i32_1 = arith.constant 0 : i32
    return %c0_i32, %c0_i32_0 : i32, i32
  }
  func.func @transform_4(%arg0: i32) -> (i32, i32) {
    %c0_i32 = arith.constant 0 : i32
    %c0_i32_0 = arith.constant 0 : i32
    %c0_i32_1 = arith.constant 0 : i32
    return %c0_i32, %c0_i32_0 : i32, i32
  }
  func.func @transform_5(%arg0: i32) -> (i32, i32) {
    %c0_i32 = arith.constant 0 : i32
    %c0_i32_0 = arith.constant 0 : i32
    %c0_i32_1 = arith.constant 0 : i32
    return %c0_i32, %c0_i32_0 : i32, i32
  }
  func.func @transform_6(%arg0: i32) -> (i32, i32) {
    %c0_i32 = arith.constant 0 : i32
    %c0_i32_0 = arith.constant 0 : i32
    %c0_i32_1 = arith.constant 0 : i32
    return %c0_i32, %c0_i32_0 : i32, i32
  }
  func.func @transform_7(%arg0: i32) -> (i32, i32) {
    %c0_i32 = arith.constant 0 : i32
    %c0_i32_0 = arith.constant 0 : i32
    %c0_i32_1 = arith.constant 0 : i32
    return %c0_i32, %c0_i32_0 : i32, i32
  }
  func.func @transform_8(%arg0: i32) -> (i32, i32) {
    %c0_i32 = arith.constant 0 : i32
    %c0_i32_0 = arith.constant 0 : i32
    %c0_i32_1 = arith.constant 0 : i32
    return %c0_i32, %c0_i32_0 : i32, i32
  }
  func.func @transform_9(%arg0: i32) -> (i32, i32) {
    %c0_i32 = arith.constant 0 : i32
    %c0_i32_0 = arith.constant 0 : i32
    %c0_i32_1 = arith.constant 0 : i32
    return %c0_i32, %c0_i32_0 : i32, i32
  }
  func.func @transform_10(%arg0: i32) -> (i32, i32) {
    %c0_i32 = arith.constant 0 : i32
    %c0_i32_0 = arith.constant 0 : i32
    %c0_i32_1 = arith.constant 0 : i32
    return %c0_i32, %c0_i32_0 : i32, i32
  }
  func.func @transform_11(%arg0: i32) -> (i32, i32) {
    %c0_i32 = arith.constant 0 : i32
    %c0_i32_0 = arith.constant 0 : i32
    %c0_i32_1 = arith.constant 0 : i32
    return %c0_i32, %c0_i32_0 : i32, i32
  }
  func.func @transform_12(%arg0: i32) -> (i32, i32) {
    %c0_i32 = arith.constant 0 : i32
    %c0_i32_0 = arith.constant 0 : i32
    %c0_i32_1 = arith.constant 0 : i32
    return %c0_i32, %c0_i32_0 : i32, i32
  }
  func.func @transform_13(%arg0: i32) -> (i32, i32) {
    %c0_i32 = arith.constant 0 : i32
    %c0_i32_0 = arith.constant 0 : i32
    %c0_i32_1 = arith.constant 0 : i32
    return %c0_i32, %c0_i32_0 : i32, i32
  }
  func.func @transform_14(%arg0: i32) -> (i32, i32) {
    %c0_i32 = arith.constant 0 : i32
    %c0_i32_0 = arith.constant 0 : i32
    %c0_i32_1 = arith.constant 0 : i32
    return %c0_i32, %c0_i32_0 : i32, i32
  }
  func.func @transform_15(%arg0: i32) -> (i32, i32) {
    %c0_i32 = arith.constant 0 : i32
    %c0_i32_0 = arith.constant 0 : i32
    %c0_i32_1 = arith.constant 0 : i32
    return %c0_i32, %c0_i32_0 : i32, i32
  }
  func.func @transform_16(%arg0: i32) -> (i32, i32) {
    %c0_i32 = arith.constant 0 : i32
    %c0_i32_0 = arith.constant 0 : i32
    return %arg0, %c0_i32 : i32, i32
  }
}

</mosaic_0001>

<bundles_post_ra>
// kernel: _forward_jit.1
= control target key start
LH: loop header
LB: loop body
LE: loop exit
PB: predicated region body
PF: predicated region fallthrough
CT: control target
= control target key end

     0   :  { %s1717_s0 = inlined_call_operand.vmem [shape: f32[16,57], index: 0, kind: input, shape index: {}]   ;;  %s1718_s1 = inlined_call_operand.vmem [shape: f32[49,512], index: 1, kind: input, shape index: {}]   ;;  %s1719_s2 = inlined_call_operand.vmem [shape: f32[1,128], index: 2, kind: input, shape index: {}]   ;;  %s1720_s3 = inlined_call_operand.vmem [shape: f32[128,64], index: 3, kind: input, shape index: {}]   ;;  %s1721_s4 = inlined_call_operand.hbm [shape: f32[1,64], index: 4, kind: input, shape index: {}]   ;;  %s1722_s5 = inlined_call_operand.vmem [shape: f32[16,32], index: 5, kind: input, shape index: {}]   ;;  %s1723_s6 = inlined_call_operand.vmem [shape: f32[6,32], index: 6, kind: input, shape index: {}]   ;;  %s1724_s7 = inlined_call_operand.vmem [shape: f32[32,16], index: 7, kind: input, shape index: {}]   ;;  %s1725_s8 = inlined_call_operand.hbm [shape: f32[1,16], index: 8, kind: input, shape index: {}]   ;;  %s1726_s9 = inlined_call_operand.vmem [shape: f32[16,8], index: 9, kind: input, shape index: {}]   ;;  %s1727_s10 = inlined_call_operand.vmem [shape: f32[1,8], index: 10, kind: input, shape index: {}]   ;;  %s1728_s11 = inlined_call_operand.vmem [shape: f32[8,2], index: 11, kind: input, shape index: {}]   ;;  %s1729_s12 = inlined_call_operand.vmem [shape: f32[2,2], index: 12, kind: input, shape index: {}]   ;;  %s1730_s13 = inlined_call_operand.vmem [shape: f32[1,2], index: 13, kind: input, shape index: {}]   ;;  %s1731_s14 = inlined_call_operand.vmem [shape: f32[2,2], index: 14, kind: input, shape index: {}]   ;;  %s1732_s15 = inlined_call_operand.vmem [shape: f32[1,2], index: 15, kind: input, shape index: {}]   ;;  %s1733_s16 = inlined_call_operand.vmem [shape: f32[16,2], index: 16, kind: output, shape index: {}]  }
   0x1   :  { %1735 = sst [smem:[#allocation8_spill]] %s1717_s0 }
   0x2   :  { %21 = vsyncpa [#allocation3], 0 }
   0x3   :  { %22 = vsyncpa [#allocation5], 0  ;;  %s1371_s21 = smov [#allocation2]   ;;  %s1372_s23 = smov [#allocation4]  }
   0x4   :  { %s37_s22 = sshll.u32 %s1371_s21, 4  ;;  %s53_s24 = sshll.u32 %s1372_s23, 4  ;;  %s38_s22 = int_to_ptr.vmem [resolvable:$true] %s37_s22  ;;  %s54_s24 = int_to_ptr.vmem [resolvable:$true] %s53_s24 }
   0x5   :  { %s1323_s27 = scalar_lea.hbm %s1721_s4, 16 }
   0x6   :  { %p1324_p0 = scmp.ne.s32.totalorder %s1721_s4, %s1323_s27  ;;  %p1327_p1 = scmp.lt.u32.totalorder %s1323_s27, %s1721_s4 }
   0x8   :  { %p1329_p2 = pnand %p1327_p1, %p1324_p0 }
   0xa   :  { %1332 = shalt.err (!%p1329_p2)
}
   0xb   :  { %s1333_s17 = scalar_lea.vmem %s38_s22, 16  ;;  %s1337_s18 = scalar_lea.vmem %s38_s22, 32 }
   0xc   :  { %p1334_p3 = scmp.ne.s32.totalorder %s38_s22, %s1333_s17  ;;  %p1338_p4 = scmp.lt.s32.totalorder %s38_s22, %s38_s22 }
   0xd   :  { %p1339_p5 = scmp.lt.s32.totalorder %s1337_s18, %s1333_s17 }
   0xf   :  { %p1340_p6 = por %p1339_p5, %p1338_p4 }
  0x11   :  { %p1341_p7 = pnand %p1340_p6, %p1334_p3 }
  0x13   :  { %1344 = shalt.err (!%p1341_p7)
}
  0x14   :  { %40 = dma.hbm_to_vmem [thread:$0]  %s1721_s4, 16, %s38_s22, [#allocation3]  }
  0x15   :  { %s1345_s25 = scalar_lea.hbm %s1725_s8, 16 }
  0x16   :  { %p1346_p8 = scmp.ne.s32.totalorder %s1725_s8, %s1345_s25  ;;  %p1349_p9 = scmp.lt.u32.totalorder %s1345_s25, %s1725_s8 }
  0x18   :  { %p1351_p10 = pnand %p1349_p9, %p1346_p8 }
  0x1a   :  { %1354 = shalt.err (!%p1351_p10)
}
  0x1b   :  { %s1355_s30 = scalar_lea.vmem %s54_s24, 16  ;;  %s1359_s0 = scalar_lea.vmem %s54_s24, 32 }
  0x1c   :  { %p1356_p11 = scmp.ne.s32.totalorder %s54_s24, %s1355_s30  ;;  %p1360_p12 = scmp.lt.s32.totalorder %s54_s24, %s54_s24 }
  0x1d   :  { %p1361_p13 = scmp.lt.s32.totalorder %s1359_s0, %s1355_s30 }
  0x1f   :  { %p1362_p0 = por %p1361_p13, %p1360_p12 }
  0x21   :  { %p1363_p1 = pnand %p1362_p0, %p1356_p11 }
  0x23   :  { %1366 = shalt.err (!%p1363_p1)
}
  0x24   :  { %56 = dma.hbm_to_vmem [thread:$0]  %s1725_s8, 16, %s54_s24, [#allocation5]  }
  0x25   :  { %1367 = dma.done.wait [#allocation3], 16  }
  0x26   :  { %1368 = vsyncadd [#allocation3], 4294967280 }
  0x27   :  { %1369 = dma.done.wait [#allocation5], 16  }
  0x28   :  { %1370 = vsyncadd [#allocation5], 4294967280  ;;  %v1373_v0 = vmov 0.0   ;;  %v80_v1 = vld [vmem:[%s1718_s1 + $0x8] sm:$0xff]  ;;  %v82_v3 = vld [vmem:[%s1718_s1 + $0x18] sm:$0xff]  ;;  %vm114_vm0 = vcmask 1040384  }
  0x29   :  { %191 = vmatprep.mubr.f32.mxu0 %v1373_v0  ;;  %268 = vmatprep.mubr.f32.mxu1 %v1373_v0  ;;  %v84_v2 = vld [vmem:[%s1718_s1 + $0x28] sm:$0xff]  ;;  %v86_v5 = vld [vmem:[%s1718_s1 + $0x38] sm:$0xff]  ;;  %v79_v6 = vld [vmem:[%s1718_s1] sm:$0xff]  ;;  %s1736_s28 = sld [smem:[#allocation8_spill]]  ;;  %vm107_vm1 = vcmask 400384   ;;  %vm438_vm4 = vcmask 1045504  }
  0x2a   :  { %v1232_v4 = vpack.c.bf16 %v84_v2, %v80_v1  ;;  %v83_v7 = vld [vmem:[%s1718_s1 + $0x20] sm:$0xff]  ;;  %v1244_v8 = vpack.c.bf16 %v86_v5, %v82_v3  ;;  %v81_v10 = vld [vmem:[%s1718_s1 + $0x10] sm:$0xff]  ;;  %v88_v12 = vld [vmem:[%s1718_s1 + $0x48] sm:$0xff]  ;;  %vm433_vm5 = vcmask 48128   ;;  %vm517_vm8 = vcmask 130048  }
  0x2b   :  { %v1234_v9 = vpack.c.bf16 %v83_v7, %v79_v6  ;;  %v85_v11 = vld [vmem:[%s1718_s1 + $0x30] sm:$0xff]  ;;  %v92_v14 = vld [vmem:[%s1718_s1 + $0x68] sm:$0xff]  ;;  %v90_v15 = vld [vmem:[%s1718_s1 + $0x58] sm:$0xff]  ;;  %vm612_vm9 = vcmask 261120   ;;  %vm803_vm10 = vcmask 1041408   ;;  %vm798_vm11 = vcmask 15360  }
  0x2c   :  { %1233 = vmatprep.subr.bf16.mxu0 %v1232_v4  ;;  %v1246_v13 = vpack.c.bf16 %v85_v11, %v81_v10  ;;  %v94_v16 = vld [vmem:[%s1718_s1 + $0x78] sm:$0xff]  ;;  %1245 = vmatprep.subr.bf16.mxu1 %v1244_v8  ;;  %v1236_v17 = vpack.c.bf16 %v92_v14, %v88_v12  ;;  %v87_v19 = vld [vmem:[%s1718_s1 + $0x40] sm:$0xff]  ;;  %v89_v21 = vld [vmem:[%s1718_s1 + $0x50] sm:$0xff]  ;;  %vm882_vm14 = vcmask 64512  }
  0x2d   :  { %1235 = vmatpush1.bf16.msra.mxu0 %v1234_v9  ;;  %v1248_v18 = vpack.c.bf16 %v94_v16, %v90_v15  ;;  %v91_v20 = vld [vmem:[%s1718_s1 + $0x60] sm:$0xff]  ;;  %v93_v23 = vld [vmem:[%s1718_s1 + $0x70] sm:$0xff]  ;;  %v96_v24 = vld [vmem:[%s1718_s1 + $0x88] sm:$0xff] }
  0x2e   :  { %1247 = vmatpush1.bf16.msra.mxu1 %v1246_v13  ;;  %v1238_v22 = vpack.c.bf16 %v91_v20, %v87_v19  ;;  %v100_v25 = vld [vmem:[%s1718_s1 + $0xa8] sm:$0xff]  ;;  %1237 = vmatprep.subr.bf16.mxu0 %v1236_v17  ;;  %v1250_v26 = vpack.c.bf16 %v93_v23, %v89_v21  ;;  %v98_v28 = vld [vmem:[%s1718_s1 + $0x98] sm:$0xff]  ;;  %v95_v30 = vld [vmem:[%s1718_s1 + $0x80] sm:$0xff] }
  0x2f   :  { %1249 = vmatprep.subr.bf16.mxu1 %v1248_v18  ;;  %v1240_v27 = vpack.c.bf16 %v100_v25, %v96_v24  ;;  %v102_v29 = vld [vmem:[%s1718_s1 + $0xb8] sm:$0xff]  ;;  %v99_v32 = vld [vmem:[%s1718_s1 + $0xa0] sm:$0xff]  ;;  %v97_v33 = vld [vmem:[%s1718_s1 + $0x90] sm:$0xff] }
  0x30   :  { %v1252_v31 = vpack.c.bf16 %v102_v29, %v98_v28  ;;  %v101_v34 = vld [vmem:[%s1718_s1 + $0xb0] sm:$0xff]  ;;  %v1242_v35 = vpack.c.bf16 %v99_v32, %v95_v30  ;;  %v104_v37 = vld [vmem:[%s1718_s1 + $0xc8] sm:$0x1]  ;;  %v106_v38 = vld [vmem:[%s1718_s1 + $0xd8] sm:$0x1] }
  0x31   :  { %1239 = vmatpush1.bf16.msra.mxu0 %v1238_v22  ;;  %v1254_v36 = vpack.c.bf16 %v101_v34, %v97_v33  ;;  %v302_v39 = vld [vmem:[%s1720_s3] sm:$0xff]  ;;  %v303_v40 = vld [vmem:[%s1720_s3 + $0x8] sm:$0xff]  ;;  %v105_v42 = vld [vmem:[%s1718_s1 + $0xd0] sm:$0x1] }
  0x32   :  { %1251 = vmatpush1.bf16.msra.mxu1 %v1250_v26  ;;  %1241 = vmatprep.subr.bf16.mxu0 %v1240_v27  ;;  %v103_v41 = vld [vmem:[%s1718_s1 + $0xc0] sm:$0x1]  ;;  %v304_v44 = vld [vmem:[%s1720_s3 + $0x10] sm:$0xff]  ;;  %v305_v45 = vld [vmem:[%s1720_s3 + $0x18] sm:$0xff]  ;;  %v1256_v46 = vpack.c.bf16 %v303_v40, %v302_v39 }
  0x33   :  { %1253 = vmatprep.subr.bf16.mxu1 %v1252_v31  ;;  %v1584_v43 = vld [vmem:[%s1736_s28] sm:$0xff]  ;;  %v1260_v47 = vpack.c.bf16 %v305_v45, %v304_v44  ;;  %v1602_v48 = vld [vmem:[%s1736_s28 + $0x8] sm:$0xff]  ;;  %v308_v52 = vld [vmem:[%s1720_s3 + $0x30] sm:$0xff] }
  0x34   :  { %v306_v49 = vld [vmem:[%s1720_s3 + $0x20] sm:$0xff]  ;;  %v307_v50 = vld [vmem:[%s1720_s3 + $0x28] sm:$0xff]  ;;  %v309_v53 = vld [vmem:[%s1720_s3 + $0x38] sm:$0xff] }
  0x35   :  { %1243 = vmatpush1.bf16.msra.mxu0 %v1242_v35  ;;  %v1264_v51 = vpack.c.bf16 %v307_v50, %v306_v49  ;;  %v1268_v54 = vpack.c.bf16 %v309_v53, %v308_v52  ;;  %v310_v55 = vld [vmem:[%s1720_s3 + $0x40] sm:$0xff]  ;;  %v311_v56 = vld [vmem:[%s1720_s3 + $0x48] sm:$0xff]  ;;  %v312_v58 = vld [vmem:[%s1720_s3 + $0x50] sm:$0xff] }
  0x36   :  { %1255 = vmatpush1.bf16.msra.mxu1 %v1254_v36  ;;  %1077 = vmatprep.subr.msk.mxu0 %vm114_vm0, %v104_v37  ;;  %v1272_v57 = vpack.c.bf16 %v311_v56, %v310_v55  ;;  %v313_v59 = vld [vmem:[%s1720_s3 + $0x58] sm:$0xff]  ;;  %v314_v61 = vld [vmem:[%s1720_s3 + $0x60] sm:$0xff]  ;;  %v315_v62 = vld [vmem:[%s1720_s3 + $0x68] sm:$0xff] }
  0x37   :  { %1081 = vmatprep.subr.msk.mxu1 %vm114_vm0, %v106_v38  ;;  %v1276_v60 = vpack.c.bf16 %v313_v59, %v312_v58  ;;  %v1280_v63 = vpack.c.bf16 %v315_v62, %v314_v61  ;;  %v317_v1 = vld [vmem:[%s1720_s3 + $0x78] sm:$0xff]  ;;  %v1085_v9 = vld [vmem:[%s1719_s2] ss:$0 sm:$0xff]  ;;  %v427_v30 = vld [vmem:[%s1722_s5 + $0x8] sm:$0xff] }
  0x38   :  { %v1086_v24 = vld [vmem:[#allocation2] ss:$0 sm:$0xff]  ;;  %v602_v50 = vld [vmem:[%s1724_s7 + $0x8] sm:$0xff]  ;;  %v604_v53 = vld [vmem:[%s1724_s7 + $0x18] sm:$0xff] }
  0x39   :  { %1078 = vmatpush1.msk.msra.mxu0 %vm114_vm0, %v103_v41  ;;  %v428_v26 = vld [vmem:[%s1723_s6] sm:$0x3f]  ;;  %s1375_s6 = smov 112  }
  0x3a   :  { %1082 = vmatpush1.msk.msra.mxu1 %vm114_vm0, %v105_v42  ;;  %1079 = vmatmul.mubr.msk.f32.vlgmr.msra.gmra.mrb[0].mxu0 %vm107_vm1, %v1584_v43  ;;  %v426_v28 = vld [vmem:[%s1722_s5] sm:$0xff]  ;;  %s1376_s5 = smov 96  }
  0x3b   :  { %1083 = vmatmul.mubr.msk.f32.vlgmr.msra.gmra.mrb[0].mxu1 %vm107_vm1, %v1584_v43  ;;  %197 = vmatprep.mubr.f32.mxu0 %v1373_v0  ;;  %v1288_v33 = vpack.c.bf16 %v427_v30, %v426_v28  ;;  %v601_v49 = vld [vmem:[%s1724_s7] sm:$0xff] }
  0x3c   :  { %274 = vmatprep.mubr.f32.mxu1 %v1373_v0  ;;  %1257 = vmatprep.subr.bf16.mxu0 %v1256_v46  ;;  %v316_v0 = vld [vmem:[%s1720_s3 + $0x70] sm:$0xff]  ;;  %s1374_s3 = smov 79   ;;  %v1292_v52 = vpack.c.bf16 %v602_v50, %v601_v49  ;;  %v696_v59 = vld [vmem:[%s1726_s9] sm:$0xff] }
  0x3d   :  { %1259 = vmatpush3.bf16.msra.mxu0 %v1256_v46  ;;  %v1284_v2 = vpack.c.bf16 %v317_v1, %v316_v0  ;;  %429 = vrot.lane.b32.xlu1 %v1584_v43, %s1374_s3  ;;  %v793_v62 = vld [vmem:[%s1729_s12] sm:$0x3] }
  0x3e   :  { %1080 = vmatmul.mubr.msk.f32.gmra.mrb[2].mxu0 %vm107_vm1, %v1602_v48  ;;  %1261 = vmatprep.subr.bf16.mxu0 %v1260_v47 }
  0x3f   :  { %1084 = vmatmul.mubr.msk.f32.gmra.mrb[2].mxu1 %vm107_vm1, %v1602_v48  ;;  %1187 = vmatprep.subr.msk.mxu1 %vm438_vm4, %v428_v26 }
  0x40   :  { %1188 = vmatpush3.msk.msra.mxu1 %vm438_vm4, %v428_v26 }
  0x41   :  { %1263 = vmatpush3.bf16.msra.mxu0 %v1260_v47  ;;  %431 = vrot.lane.b32.xlu1 %v1602_v48, %s1374_s3  ;;  %s1377_s3 = smov 73  }
  0x42   :  { %1265 = vmatprep.subr.bf16.mxu0 %v1264_v51  ;;  %1289 = vmatprep.subr.bf16.mxu1 %v1288_v33 }
  0x45   :  { %1267 = vmatpush3.bf16.msra.mxu0 %v1264_v51  ;;  %v603_v51 = vld [vmem:[%s1724_s7 + $0x10] sm:$0xff] }
  0x46   :  { %1269 = vmatprep.subr.bf16.mxu0 %v1268_v54 }
  0x49   :  { %1271 = vmatpush3.bf16.msra.mxu0 %v1268_v54  ;;  %v1296_v54 = vpack.c.bf16 %v604_v53, %v603_v51 }
  0x4a   :  { %1273 = vmatprep.subr.bf16.mxu0 %v1272_v57 }
  0x4d   :  { %1275 = vmatpush3.bf16.msra.mxu0 %v1272_v57 }
  0x4e   :  { %1277 = vmatprep.subr.bf16.mxu0 %v1276_v60 }
  0x51   :  { %1279 = vmatpush3.bf16.msra.mxu0 %v1276_v60  ;;  %v697_v60 = vld [vmem:[%s1726_s9 + $0x8] sm:$0xff] }
  0x52   :  { %1281 = vmatprep.subr.bf16.mxu0 %v1280_v63  ;;  %v1300_v61 = vpack.c.bf16 %v697_v60, %v696_v59 }
  0x55   :  { %1283 = vmatpush3.bf16.msra.mxu0 %v1280_v63  ;;  %v1092_v63 = vld [vmem:[#allocation4] ss:$0 sm:$0xff] }
  0x56   :  { %1285 = vmatprep.subr.bf16.mxu0 %v1284_v2 }
  0x59   :  { %1287 = vmatpush3.bf16.msra.mxu0 %v1284_v2 }
  0xaf   :  { %v430_v27 = vpop.permute.xlu1 %429 }
  0xb0   :  { %1189 = vmatprep.mubr.msk.f32.mxu1 %vm433_vm5, %v430_v27 }
  0xb3   :  { %v432_v35 = vpop.permute.xlu1 %431 }
  0xb4   :  { %1190 = vmatmul.mubr.msk.f32.vlgmr.msra.gmra.mrb[4].mxu1 %vm433_vm5, %v432_v35 }
  0xb5   :  { %1291 = vmatpush3.bf16.msra.mxu1 %v1288_v33 }
  0xb6   :  { %1293 = vmatprep.subr.bf16.mxu1 %v1292_v52 }
 0x10d   :  { %v193_v3 = vpop.f32.mrb[0].mxu0 }
 0x10e   :  { %v270_v4 = vpop.f32.mrb[0].mxu1  ;;  %v195_v5 = vpop.f32.mrb[1].mxu0 }
 0x10f   :  { %v281_v6 = vmax.f32 %v193_v3, %v195_v5  ;;  %v272_v7 = vpop.f32.mrb[1].mxu1 }
 0x110   :  { %v283_v8 = vmax.f32 %v270_v4, %v272_v7  ;;  %v1095_v7 = vld [vmem:[%s1727_s10] ss:$0 sm:$0xff] }
 0x111   :  { %v199_v10 = vpop.f32.mrb[2].mxu0 }
 0x112   :  { %v285_v11 = vmax.f32 %v281_v6, %v283_v8  ;;  %v276_v12 = vpop.f32.mrb[2].mxu1  ;;  %v201_v13 = vpop.f32.mrb[3].mxu0 }
 0x113   :  { %v282_v14 = vmax.f32 %v199_v10, %v201_v13  ;;  %v278_v15 = vpop.f32.mrb[3].mxu1 }
 0x114   :  { %v294_v16 = vadd.f32 %v1085_v9, %v285_v11  ;;  %v284_v17 = vmax.f32 %v276_v12, %v278_v15 }
 0x116   :  { %v286_v18 = vmax.f32 %v282_v14, %v284_v17  ;;  %vm296_vm2 = vcmp.gt.f32.partialorder %v294_v16, 0.0  ;;  %v298_v19 = vmul.f32 0.01, %v294_v16  ;;  %v1103_v17 = vld [vmem:[%s1730_s13] ss:$0 sm:$0xff] }
 0x118   :  { %v295_v20 = vadd.f32 %v1085_v9, %v286_v18  ;;  %v300_v21 = vsel %vm296_vm2, %v294_v16, %v298_v19  ;;  %v977_v16 = vld [vmem:[%s1731_s14] sm:$0x3] }
 0x119   :  { %1184 = vmatprep.mubr.f32.mxu0 %v300_v21  ;;  %1227 = vmatprep.subr.msk.mxu0 %vm803_vm10, %v977_v16 }
 0x11a   :  { %v299_v22 = vmul.f32 0.01, %v295_v20  ;;  %vm297_vm3 = vcmp.gt.f32.partialorder %v295_v20, 0.0 }
 0x11c   :  { %v301_v23 = vsel %vm297_vm3, %v295_v20, %v299_v22 }
 0x11d   :  { %1185 = vmatmul.mubr.f32.vlgmr.msra.gmra.mrb[4].mxu0 %v301_v23 }
 0x11e   :  { %1228 = vmatpush3.msk.msra.mxu0 %vm803_vm10, %v977_v16 }
 0x1f0   :  { %v1186_v25 = vpop.f32.mrb[4].mxu0 }
 0x1f1   :  { %v391_v29 = vpop.f32.mrb[5].mxu0  ;;  %v397_v31 = vadd.f32 %v1186_v25, %v1086_v24 }
 0x1f2   :  { %v392_v32 = vadd.f32 %v1086_v24, %v391_v29  ;;  %v1104_v24 = vld [vmem:[%s1732_s15] ss:$0 sm:$0xff] }
 0x1f3   :  { %v403_v36 = vmul.f32 0.01, %v397_v31  ;;  %vm401_vm7 = vcmp.gt.f32.partialorder %v397_v31, 0.0 }
 0x1f4   :  { %vm400_vm6 = vcmp.gt.f32.partialorder %v392_v32, 0.0  ;;  %v402_v34 = vmul.f32 0.01, %v392_v32 }
 0x1f5   :  { %v405_v38 = vsel %vm401_vm7, %v397_v31, %v403_v36 }
 0x1f6   :  { %v404_v37 = vsel %vm400_vm6, %v392_v32, %v402_v34 }
 0x1f7   :  { %408 = vrot.lane.b32.xlu0 %v404_v37, %s1375_s6 }
 0x1fb   :  { %410 = vrot.lane.b32.xlu0 %v405_v38, %s1375_s6 }
 0x269   :  { %v409_v39 = vpop.permute.xlu0 %408 }
 0x26a   :  { %v414_v40 = vmax.f32 %v404_v37, %v409_v39 }
 0x26c   :  { %418 = vrot.lane.b32.xlu0 %v414_v40, %s1376_s5 }
 0x26d   :  { %v411_v41 = vpop.permute.xlu0 %410 }
 0x26e   :  { %v415_v42 = vmax.f32 %v405_v38, %v411_v41 }
 0x270   :  { %420 = vrot.lane.b32.xlu1 %v415_v42, %s1376_s5  ;;  %794 = vrot.lane.b32.xlu0 %v1584_v43, %s1377_s3  ;;  %v792_v43 = vld [vmem:[%s1728_s11] sm:$0xff] }
 0x274   :  { %796 = vrot.lane.b32.xlu1 %v1602_v48, %s1377_s3 }
 0x2de   :  { %v419_v44 = vpop.permute.xlu0 %418 }
 0x2df   :  { %v424_v45 = vmax.f32 %v414_v40, %v419_v44 }
 0x2e1   :  { %1196 = vmatprep.mubr.msk.f32.mxu1 %vm517_vm8, %v424_v45 }
 0x2e2   :  { %v421_v46 = vpop.permute.xlu1 %420  ;;  %v795_v5 = vpop.permute.xlu0 %794 }
 0x2e3   :  { %v425_v47 = vmax.f32 %v415_v42, %v421_v46 }
 0x2e5   :  { %1197 = vmatmul.mubr.msk.f32.vlgmr.msra.gmra.mrb[4].mxu1 %vm517_vm8, %v425_v47 }
 0x2e6   :  { %1295 = vmatpush3.bf16.msra.mxu1 %v1292_v52  ;;  %v797_v48 = vpop.permute.xlu1 %796 }
 0x2e7   :  { %1297 = vmatprep.subr.bf16.mxu1 %v1296_v54 }
 0x2ea   :  { %1299 = vmatpush3.bf16.msra.mxu1 %v1296_v54 }
 0x2eb   :  { %1301 = vmatprep.subr.bf16.mxu1 %v1300_v61 }
 0x3b8   :  { %v1198_v55 = vpop.f32.mrb[4].mxu1 }
 0x3b9   :  { %v590_v56 = vpop.f32.mrb[5].mxu1 }
 0x3ba   :  { %1315 = vtanh.f32 %v590_v56 }
 0x3bb   :  { %1317 = vtanh.f32 %v1198_v55 }
 0x3c4   :  { %v1316_v57 = vpop.eup %1315 }
 0x3c5   :  { %v1318_v58 = vpop.eup %1317  ;;  %1207 = vmatprep.mubr.msk.f32.mxu1 %vm612_vm9, %v1316_v57 }
 0x3c6   :  { %1208 = vmatmul.mubr.msk.f32.vlgmr.msra.gmra.mrb[6].mxu1 %vm612_vm9, %v1318_v58 }
 0x3c7   :  { %1303 = vmatpush3.bf16.msra.mxu1 %v1300_v61 }
 0x3c8   :  { %1217 = vmatprep.subr.msk.mxu1 %vm803_vm10, %v793_v62 }
 0x499   :  { %v1209_v0 = vpop.f32.mrb[6].mxu1 }
 0x49a   :  { %v691_v1 = vadd.f32 %v1209_v0, %v1092_v63  ;;  %v685_v2 = vpop.f32.mrb[7].mxu1 }
 0x49b   :  { %v686_v3 = vadd.f32 %v1092_v63, %v685_v2 }
 0x49d   :  { %1319 = vtanh.f32 %v686_v3 }
 0x49e   :  { %1321 = vtanh.f32 %v691_v1 }
 0x4a7   :  { %v1320_v4 = vpop.eup %1319 }
 0x4a8   :  { %v1322_v6 = vpop.eup %1321  ;;  %1214 = vmatprep.mubr.msk.f32.mxu1 %vm517_vm8, %v1320_v4 }
 0x4a9   :  { %1215 = vmatmul.mubr.msk.f32.vlgmr.msra.gmra.mrb[8].mxu1 %vm517_vm8, %v1322_v6 }
 0x4aa   :  { %1218 = vmatpush3.msk.msra.mxu1 %vm803_vm10, %v793_v62  ;;  %1219 = vmatprep.mubr.msk.f32.mxu1 %vm798_vm11, %v795_v5 }
 0x4ab   :  { %1222 = vmatprep.subr.mxu1 %v792_v43 }
 0x4ad   :  { %1220 = vmatmul.mubr.msk.f32.vlgmr.msra.gmra.mrb[10].mxu1 %vm798_vm11, %v797_v48 }
 0x4ae   :  { %1223 = vmatpush3.msra.mxu1 %v792_v43 }
 0x57c   :  { %v1216_v8 = vpop.f32.mrb[8].mxu1 }
 0x57d   :  { %v783_v9 = vadd.f32 %v1216_v8, %v1095_v7  ;;  %v777_v10 = vpop.f32.mrb[9].mxu1 }
 0x57e   :  { %v778_v11 = vadd.f32 %v1095_v7, %v777_v10 }
 0x57f   :  { %v789_v12 = vmul.f32 0.01, %v783_v9  ;;  %vm787_vm12 = vcmp.gt.f32.partialorder %v783_v9, 0.0 }
 0x580   :  { %vm786_vm13 = vcmp.gt.f32.partialorder %v778_v11, 0.0  ;;  %v788_v13 = vmul.f32 0.01, %v778_v11 }
 0x581   :  { %v791_v15 = vsel %vm787_vm12, %v783_v9, %v789_v12 }
 0x582   :  { %v790_v14 = vsel %vm786_vm13, %v778_v11, %v788_v13 }
 0x583   :  { %1224 = vmatprep.mubr.msk.f32.mxu1 %vm882_vm14, %v790_v14 }
 0x584   :  { %1225 = vmatmul.mubr.msk.f32.vlgmr.msra.gmra.mrb[10].mxu1 %vm882_vm14, %v791_v15 }
 0x657   :  { %v1226_v18 = vpop.f32.mrb[10].mxu1 }
 0x658   :  { %v972_v19 = vadd.f32 %v1226_v18, %v1103_v17  ;;  %v955_v20 = vpop.f32.mrb[11].mxu1 }
 0x659   :  { %v971_v21 = vadd.f32 %v1103_v17, %v955_v20 }
 0x65a   :  { %v976_v23 = vadd.f32 %v972_v19, %v797_v48 }
 0x65b   :  { %v975_v22 = vadd.f32 %v971_v21, %v795_v5 }
 0x65d   :  { %1229 = vmatprep.mubr.msk.f32.mxu0 %vm798_vm11, %v975_v22 }
 0x65e   :  { %1230 = vmatmul.mubr.msk.f32.vlgmr.msra.gmra.mrb[6].mxu0 %vm798_vm11, %v976_v23 }
 0x731   :  { %v1231_v25 = vpop.f32.mrb[6].mxu0 }
 0x732   :  { %v1066_v26 = vadd.f32 %v1231_v25, %v1104_v24  ;;  %v1060_v27 = vpop.f32.mrb[7].mxu0 }
 0x733   :  { %v1061_v28 = vadd.f32 %v1104_v24, %v1060_v27 }
 0x734   :  { %1070 = vst.msk [vmem:[%s1733_s16 + $0x8] sm:$0xff] %vm798_vm11, %v1066_v26 }
 0x735   :  { %1069 = vst.msk [vmem:[%s1733_s16] sm:$0xff] %vm798_vm11, %v1061_v28 }
 0x736   :  { %1075 = vsyncpa [#allocation3], 1 }
 0x737   :  { %1076 = vsyncpa [#allocation5], 1 }

</bundles_post_ra>
